<compile_context>
chip_gen: v5e
topology: v5e:2x2
jax: 0.10.0
libtpu: 0.0.40
codegen_flags: <defaults>
</compile_context>

<pallas_src>
import functools

import jax
import jax.numpy as jnp
from jax.experimental import pallas as pl
from jax.experimental.pallas import tpu as pltpu


def _ceil_to(x: int, m: int) -> int:
    return ((x + m - 1) // m) * m


def _cdiv(a: int, b: int) -> int:
    return (a + b - 1) // b


def _make_policy_kernel(action_dim: int):
    """Kernel closure over the (static) number of real action rows."""

    def kernel(xt_ref, w1t_ref, b1t_ref, wht_ref, bht_ref, out_ref):
        # Shared layer (transposed): h^T = W1^T @ x^T + b1^T, ReLU.   MXU matmul #1
        xt = xt_ref[...]                                        # [obs_dim, tb]
        ht = jnp.dot(w1t_ref[...], xt,
                     preferred_element_type=jnp.float32) + b1t_ref[...]
        ht = jnp.maximum(ht, 0.0)                               # [hidden, tb]

        # Fused actor+critic heads (transposed).                 MXU matmul #2
        #   rows [0, action_dim)   -> action logits
        #   row  action_dim        -> state value
        #   rows (action_dim, 8)   -> exact zeros (zero-padded weights/bias)
        heads = jnp.dot(wht_ref[...], ht,
                        preferred_element_type=jnp.float32) + bht_ref[...]  # [8, tb]

        # Softmax over the action rows only (sublane axis); value/pad rows masked.
        row = jax.lax.broadcasted_iota(jnp.int32, heads.shape, 0)
        is_action = row < action_dim
        logits = jnp.where(is_action, heads, jnp.float32(-1e30))
        m = jnp.max(logits, axis=0, keepdims=True)              # [1, tb]
        e = jnp.exp(logits - m)                                 # masked rows underflow to 0
        denom = jnp.sum(e, axis=0, keepdims=True)               # [1, tb], >= 1
        probs = e / denom                                       # exact normalization

        # Packed output: probs on action rows, raw head value elsewhere
        # (row action_dim = state value; remaining rows are exact zeros).
        out_ref[...] = jnp.where(is_action, probs, heads)

    return kernel


@functools.partial(jax.jit, static_argnames=("tile_b",))
def policy_forward(state, params, *, tile_b: int = 1024):
    """state: [B, obs_dim] f32.  params: dict of weights/biases.

    Returns (action_prob [B, action_dim], state_value [B, 1]).
    """
    B, obs_dim = state.shape
    hidden = params["w1"].shape[1]
    action_dim = params["wa"].shape[1]

    # ---- wrapper-side head fusion (transposed, sublane-padded to 8 rows) ----
    head_rows = _ceil_to(action_dim + 1, 8)
    wh = jnp.concatenate([params["wa"], params["wv"]], axis=1)   # [hidden, A+1]
    bh = jnp.concatenate([params["ba"], params["bv"]], axis=1)   # [1, A+1]
    row_pad = head_rows - (action_dim + 1)
    wh_t = jnp.pad(wh, ((0, 0), (0, row_pad))).T                 # [head_rows, hidden]
    bh_t = jnp.pad(bh, ((0, 0), (0, row_pad))).T                 # [head_rows, 1]
    w1_t = params["w1"].T                                        # [hidden, obs_dim]
    b1_t = params["b1"].T                                        # [hidden, 1]

    # ---- batch tiling: batch lives on the LANE axis -------------------------
    pad_b = _ceil_to(B, 128)
    n_tiles = max(1, _cdiv(pad_b, tile_b))
    if pad_b >= 256:
        n_tiles = max(n_tiles, 2)        # v7x: give both TensorCores >= 1 tile
    tb = _ceil_to(_cdiv(pad_b, n_tiles), 128)
    padded_B = n_tiles * tb
    xt = jnp.pad(state.T, ((0, 0), (0, padded_B - B)))           # [obs_dim, padded_B]

    out = pl.pallas_call(
        _make_policy_kernel(action_dim),
        out_shape=jax.ShapeDtypeStruct((head_rows, padded_B), jnp.float32),
        grid_spec=pltpu.PrefetchScalarGridSpec(
            num_scalar_prefetch=0,
            grid=(n_tiles,),
            in_specs=[
                pl.BlockSpec((obs_dim, tb), lambda i: (0, i)),          # x^T tile
                pl.BlockSpec((hidden, obs_dim), lambda i: (0, 0)),      # W1^T (resident)
                pl.BlockSpec((hidden, 1), lambda i: (0, 0)),            # b1^T (resident)
                pl.BlockSpec((head_rows, hidden), lambda i: (0, 0)),    # fused heads W^T
                pl.BlockSpec((head_rows, 1), lambda i: (0, 0)),         # fused heads b^T
            ],
            out_specs=pl.BlockSpec((head_rows, tb), lambda i: (0, i)),
        ),
        compiler_params=pltpu.CompilerParams(
            dimension_semantics=("parallel",),   # shard batch tiles across TCs on v7x
        ),
    )(xt, w1_t, b1_t, wh_t, bh_t)

    action_prob = out[:action_dim, :B].T
    state_value = out[action_dim:action_dim + 1, :B].T
    return action_prob, state_value


def init_params(key, obs_dim, action_dim, hidden):
    """Deterministic PyTorch-style uniform(-1/sqrt(fan_in), 1/sqrt(fan_in)) init."""
    ks = jax.random.split(key, 6)

    def lin(kw, kb, fan_in, fan_out):
        bound = 1.0 / jnp.sqrt(jnp.float32(fan_in))
        w = jax.random.uniform(kw, (fan_in, fan_out), jnp.float32, -bound, bound)
        b = jax.random.uniform(kb, (1, fan_out), jnp.float32, -bound, bound)
        return w, b

    w1, b1 = lin(ks[0], ks[1], obs_dim, hidden)
    wa, ba = lin(ks[2], ks[3], hidden, action_dim)
    wv, bv = lin(ks[4], ks[5], hidden, 1)
    return {"w1": w1, "b1": b1, "wa": wa, "ba": ba, "wv": wv, "bv": bv}


if __name__ == "__main__":
    # Small shapes consistent with a gym env, e.g. LunarLander-v2:
    #   observation_dim = 8, action_dim = 4, hidden_size = 128, batch = 8
    B, OBS_DIM, ACTION_DIM, HIDDEN = 8, 8, 4, 128

    key = jax.random.PRNGKey(0)
    k_params, k_state = jax.random.split(key)

    params = init_params(k_params, OBS_DIM, ACTION_DIM, HIDDEN)
    state = jax.random.normal(k_state, (B, OBS_DIM), dtype=jnp.float32)

    action_prob, state_value = policy_forward(state, params)
    jax.block_until_ready((action_prob, state_value))

    # Pure-JAX reference.
    h_ref = jnp.maximum(state @ params["w1"] + params["b1"], 0.0)
    prob_ref = jax.nn.softmax(h_ref @ params["wa"] + params["ba"], axis=-1)
    value_ref = h_ref @ params["wv"] + params["bv"]

    assert action_prob.shape == (B, ACTION_DIM)
    assert state_value.shape == (B, 1)
    assert jnp.allclose(jnp.sum(action_prob, axis=-1), 1.0, atol=1e-5)
    assert jnp.allclose(action_prob, prob_ref, atol=1e-4)
    assert jnp.allclose(state_value, value_ref, atol=1e-4)

    print("KERNEL_OK")
</pallas_src>

<mosaic_0001>
module attributes {stable_mosaic.version = 11 : i64} {
  func.func @kernel(%arg0: i32, %arg1: memref<8x128xf32, #tpu.memory_space<vmem>>, %arg2: memref<128x8xf32, #tpu.memory_space<vmem>>, %arg3: memref<128x1xf32, #tpu.memory_space<vmem>>, %arg4: memref<8x128xf32, #tpu.memory_space<vmem>>, %arg5: memref<8x1xf32, #tpu.memory_space<vmem>>, %arg6: memref<8x128xf32, #tpu.memory_space<vmem>>) attributes {dimension_semantics = [#tpu.dimension_semantics<parallel>], iteration_bounds = array<i64: 1>, scalar_prefetch = 0 : i64, scratch_operands = 0 : i64, tpu.core_type = #tpu.core_type<tc>, window_params = [{transform_indices = @transform_0, window_bounds = array<i64: 8, 128>}, {pipeline_mode = #tpu.pipeline_mode<synchronous>, transform_indices = @transform_1, window_bounds = array<i64: 128, 8>}, {pipeline_mode = #tpu.pipeline_mode<synchronous>, transform_indices = @transform_2, window_bounds = array<i64: 128, 1>}, {pipeline_mode = #tpu.pipeline_mode<synchronous>, transform_indices = @transform_3, window_bounds = array<i64: 8, 128>}, {pipeline_mode = #tpu.pipeline_mode<synchronous>, transform_indices = @transform_4, window_bounds = array<i64: 8, 1>}, {transform_indices = @transform_5, window_bounds = array<i64: 8, 128>}]} {
    %c0 = arith.constant 0 : index
    %c0_0 = arith.constant 0 : index
    %0 = vector.load %arg1[%c0, %c0_0] : memref<8x128xf32, #tpu.memory_space<vmem>>, vector<8x128xf32>
    %c0_1 = arith.constant 0 : index
    %c0_2 = arith.constant 0 : index
    %1 = vector.load %arg2[%c0_1, %c0_2] : memref<128x8xf32, #tpu.memory_space<vmem>>, vector<128x8xf32>
    %cst = arith.constant dense<0.000000e+00> : vector<128x128xf32>
    %2 = tpu.matmul %1, %0, %cst {dimension_numbers = #tpu.dot_dimension_numbers<[1], [0], [0], [1], [0, 0, 1, 1], [], []>} : vector<128x8xf32>, vector<8x128xf32>, vector<128x128xf32> -> vector<128x128xf32>
    %c0_3 = arith.constant 0 : index
    %c0_4 = arith.constant 0 : index
    %3 = vector.load %arg3[%c0_3, %c0_4] : memref<128x1xf32, #tpu.memory_space<vmem>>, vector<128x1xf32>
    %4 = vector.broadcast %3 : vector<128x1xf32> to vector<128x128xf32>
    %5 = arith.addf %2, %4 : vector<128x128xf32>
    %cst_5 = arith.constant 0.000000e+00 : f32
    %6 = vector.broadcast %cst_5 : f32 to vector<128x128xf32>
    %7 = arith.maximumf %5, %6 : vector<128x128xf32>
    %c0_6 = arith.constant 0 : index
    %c0_7 = arith.constant 0 : index
    %8 = vector.load %arg4[%c0_6, %c0_7] : memref<8x128xf32, #tpu.memory_space<vmem>>, vector<8x128xf32>
    %cst_8 = arith.constant dense<0.000000e+00> : vector<8x128xf32>
    %9 = tpu.matmul %8, %7, %cst_8 {dimension_numbers = #tpu.dot_dimension_numbers<[1], [0], [0], [1], [0, 0, 1, 1], [], []>} : vector<8x128xf32>, vector<128x128xf32>, vector<8x128xf32> -> vector<8x128xf32>
    %c0_9 = arith.constant 0 : index
    %c0_10 = arith.constant 0 : index
    %10 = vector.load %arg5[%c0_9, %c0_10] : memref<8x1xf32, #tpu.memory_space<vmem>>, vector<8x1xf32>
    %11 = vector.broadcast %10 : vector<8x1xf32> to vector<8x128xf32>
    %12 = arith.addf %9, %11 : vector<8x128xf32>
    %13 = tpu.iota {dimensions = array<i32: 0>} : vector<8x128xi32>
    %c4_i32 = arith.constant 4 : i32
    %14 = vector.broadcast %c4_i32 : i32 to vector<8x128xi32>
    %15 = arith.cmpi slt, %13, %14 : vector<8x128xi32>
    %cst_11 = arith.constant -1.000000e+30 : f32
    %16 = vector.broadcast %cst_11 : f32 to vector<8x128xf32>
    %17 = arith.select %15, %12, %16 : vector<8x128xi1>, vector<8x128xf32>
    %cst_12 = arith.constant dense<0xFF800000> : vector<128xf32>
    %18 = vector.multi_reduction <maximumf>, %17, %cst_12 [0] : vector<8x128xf32> to vector<128xf32>
    %19 = vector.shape_cast %18 : vector<128xf32> to vector<1x128xf32>
    %20 = vector.broadcast %19 : vector<1x128xf32> to vector<8x128xf32>
    %21 = arith.subf %17, %20 : vector<8x128xf32>
    %22 = math.exp %21 : vector<8x128xf32>
    %cst_13 = arith.constant dense<0.000000e+00> : vector<128xf32>
    %23 = vector.multi_reduction <add>, %22, %cst_13 [0] : vector<8x128xf32> to vector<128xf32>
    %24 = vector.shape_cast %23 : vector<128xf32> to vector<1x128xf32>
    %25 = vector.broadcast %24 : vector<1x128xf32> to vector<8x128xf32>
    %26 = arith.divf %22, %25 : vector<8x128xf32>
    %27 = arith.select %15, %26, %12 : vector<8x128xi1>, vector<8x128xf32>
    %c0_14 = arith.constant 0 : index
    %c0_15 = arith.constant 0 : index
    %28 = vector.load %arg6[%c0_14, %c0_15] : memref<8x128xf32, #tpu.memory_space<vmem>>, vector<8x128xf32>
    tpu.vector_store %arg6[%c0_14, %c0_15], %27 {strides = array<i32>} : memref<8x128xf32, #tpu.memory_space<vmem>>, vector<8x128xf32>,
    return
  }
  func.func @transform_0(%arg0: i32) -> (i32, i32) {
    %c0_i32 = arith.constant 0 : i32
    %c0_i32_0 = arith.constant 0 : i32
    return %c0_i32, %arg0 : i32, i32
  }
  func.func @transform_1(%arg0: i32) -> (i32, i32) {
    %c0_i32 = arith.constant 0 : i32
    %c0_i32_0 = arith.constant 0 : i32
    %c0_i32_1 = arith.constant 0 : i32
    return %c0_i32, %c0_i32_0 : i32, i32
  }
  func.func @transform_2(%arg0: i32) -> (i32, i32) {
    %c0_i32 = arith.constant 0 : i32
    %c0_i32_0 = arith.constant 0 : i32
    %c0_i32_1 = arith.constant 0 : i32
    return %c0_i32, %c0_i32_0 : i32, i32
  }
  func.func @transform_3(%arg0: i32) -> (i32, i32) {
    %c0_i32 = arith.constant 0 : i32
    %c0_i32_0 = arith.constant 0 : i32
    %c0_i32_1 = arith.constant 0 : i32
    return %c0_i32, %c0_i32_0 : i32, i32
  }
  func.func @transform_4(%arg0: i32) -> (i32, i32) {
    %c0_i32 = arith.constant 0 : i32
    %c0_i32_0 = arith.constant 0 : i32
    %c0_i32_1 = arith.constant 0 : i32
    return %c0_i32, %c0_i32_0 : i32, i32
  }
  func.func @transform_5(%arg0: i32) -> (i32, i32) {
    %c0_i32 = arith.constant 0 : i32
    %c0_i32_0 = arith.constant 0 : i32
    return %c0_i32, %arg0 : i32, i32
  }
}

</mosaic_0001>

<bundles_post_ra>
// kernel: policy_forward.1
= control target key start
LH: loop header
LB: loop body
LE: loop exit
PB: predicated region body
PF: predicated region fallthrough
CT: control target
= control target key end

     0   :  { %v356_v0 = vmov 0   ;;  %vm133_vm0 = vcmask 64512   ;;  %s519_s2 = inlined_call_operand.vmem [shape: f32[128,1], index: 2, kind: input, shape index: {}]   ;;  %s520_s0 = inlined_call_operand.vmem [shape: f32[8,128], index: 0, kind: input, shape index: {}]   ;;  %s521_s1 = inlined_call_operand.vmem [shape: f32[128,8], index: 1, kind: input, shape index: {}]   ;;  %s522_s4 = inlined_call_operand.vmem [shape: f32[8,1], index: 4, kind: input, shape index: {}]   ;;  %s523_s3 = inlined_call_operand.vmem [shape: f32[8,128], index: 3, kind: input, shape index: {}]   ;;  %s524_s5 = inlined_call_operand.vmem [shape: f32[8,128], index: 5, kind: output, shape index: {}]  }
   0x1   :  { %349 = vset.pattern.permute.xlu0 %v356_v0  ;;  %v52_v1 = vld [vmem:[%s519_s2 + $0x78] sm:$0xff]  ;;  %v20_v2 = vld [vmem:[%s520_s0] sm:$0xff]  ;;  %350 = vset.pattern.permute.xlu1 %v356_v0  ;;  %v27_v4 = vld [vmem:[%s521_s1 + $0x30] sm:$0xff] }
   0x2   :  { %v21_v3 = vld [vmem:[%s521_s1] sm:$0xff]  ;;  %130 = vperm.xlu0 %349, %v52_v1   ;;  %197 = vmatpush.msra.mxu0 %v20_v2  ;;  %v50_v6 = vld [vmem:[%s519_s2 + $0x68] sm:$0xff]  ;;  %v51_v7 = vld [vmem:[%s519_s2 + $0x70] sm:$0xff] }
   0x3   :  { %v33_v5 = vld [vmem:[%s521_s1 + $0x60] sm:$0xff]  ;;  %346 = vmatpush.msra.mxu2 %v20_v2  ;;  %347 = vmatpush.msra.mxu3 %v20_v2  ;;  %v48_v8 = vld [vmem:[%s519_s2 + $0x58] sm:$0xff]  ;;  %v22_v9 = vld [vmem:[%s521_s1 + $0x8] sm:$0xff] }
   0x4   :  { %330 = vmatmul.msk.f32.vlgmr.msra.gmra.mxu0 %vm133_vm0, %v21_v3  ;;  %336 = vmatmul.msk.f32.vlgmr.msra.gmra.mxu2 %vm133_vm0, %v27_v4  ;;  %v28_v10 = vld [vmem:[%s521_s1 + $0x38] sm:$0xff]  ;;  %v34_v11 = vld [vmem:[%s521_s1 + $0x68] sm:$0xff]  ;;  %v49_v12 = vld [vmem:[%s519_s2 + $0x60] sm:$0xff] }
   0x5   :  { %342 = vmatmul.msk.f32.vlgmr.msra.gmra.mxu3 %vm133_vm0, %v33_v5  ;;  %120 = vperm.xlu1 %350, %v50_v6   ;;  %v47_v13 = vld [vmem:[%s519_s2 + $0x50] sm:$0xff]  ;;  %v46_v14 = vld [vmem:[%s519_s2 + $0x48] sm:$0xff]  ;;  %v29_v16 = vld [vmem:[%s521_s1 + $0x40] sm:$0xff] }
   0x6   :  { %351 = vset.pattern.permute.xlu2 %v356_v0  ;;  %v23_v15 = vld [vmem:[%s521_s1 + $0x10] sm:$0xff]  ;;  %v45_v18 = vld [vmem:[%s519_s2 + $0x40] sm:$0xff]  ;;  %v44_v19 = vld [vmem:[%s519_s2 + $0x38] sm:$0xff] }
   0x7   :  { %110 = vperm.xlu2 %351, %v48_v8   ;;  %v35_v17 = vld [vmem:[%s521_s1 + $0x70] sm:$0xff]  ;;  %v24_v21 = vld [vmem:[%s521_s1 + $0x18] sm:$0xff]  ;;  %v30_v22 = vld [vmem:[%s521_s1 + $0x48] sm:$0xff] }
   0x8   :  { %v43_v20 = vld [vmem:[%s519_s2 + $0x30] sm:$0xff]  ;;  %v36_v23 = vld [vmem:[%s521_s1 + $0x78] sm:$0xff]  ;;  %v42_v24 = vld [vmem:[%s519_s2 + $0x28] sm:$0xff] }
   0x9   :  { %v41_v25 = vld [vmem:[%s519_s2 + $0x20] sm:$0xff]  ;;  %v40_v26 = vld [vmem:[%s519_s2 + $0x18] sm:$0xff]  ;;  %v31_v28 = vld [vmem:[%s521_s1 + $0x50] sm:$0xff] }
   0xa   :  { %125 = vperm.xlu0 %349, %v51_v7   ;;  %v25_v27 = vld [vmem:[%s521_s1 + $0x20] sm:$0xff]  ;;  %v39_v29 = vld [vmem:[%s519_s2 + $0x10] sm:$0xff]  ;;  %v38_v30 = vld [vmem:[%s519_s2 + $0x8] sm:$0xff] }
   0xb   :  { %v37_v31 = vld [vmem:[%s519_s2] sm:$0xff]  ;;  %v26_v32 = vld [vmem:[%s521_s1 + $0x28] sm:$0xff]  ;;  %v32_v33 = vld [vmem:[%s521_s1 + $0x58] sm:$0xff] }
   0xc   :  { %331 = vmatmul.msk.f32.gmra.mxu0 %vm133_vm0, %v22_v9  ;;  %337 = vmatmul.msk.f32.gmra.mxu2 %vm133_vm0, %v28_v10  ;;  %v264_v34 = vld [vmem:[%s522_s4] sm:$0xff] }
   0xd   :  { %343 = vmatmul.msk.f32.gmra.mxu3 %vm133_vm0, %v34_v11  ;;  %115 = vperm.xlu1 %350, %v49_v12  }
   0xf   :  { %105 = vperm.xlu2 %351, %v47_v13  }
  0x12   :  { %100 = vperm.xlu0 %349, %v46_v14  }
  0x14   :  { %332 = vmatmul.msk.f32.gmra.mxu0 %vm133_vm0, %v23_v15  ;;  %338 = vmatmul.msk.f32.gmra.mxu2 %vm133_vm0, %v29_v16 }
  0x15   :  { %344 = vmatmul.msk.f32.gmra.mxu3 %vm133_vm0, %v35_v17  ;;  %95 = vperm.xlu1 %350, %v45_v18  }
  0x17   :  { %90 = vperm.xlu2 %351, %v44_v19  }
  0x1a   :  { %85 = vperm.xlu0 %349, %v43_v20  }
  0x1c   :  { %333 = vmatmul.msk.f32.gmra.mxu0 %vm133_vm0, %v24_v21  ;;  %339 = vmatmul.msk.f32.gmra.mxu2 %vm133_vm0, %v30_v22 }
  0x1d   :  { %345 = vmatmul.msk.f32.gmra.mxu3 %vm133_vm0, %v36_v23  ;;  %80 = vperm.xlu1 %350, %v42_v24  }
  0x1f   :  { %75 = vperm.xlu2 %351, %v41_v25  }
  0x22   :  { %70 = vperm.xlu0 %349, %v40_v26  }
  0x24   :  { %334 = vmatmul.msk.f32.gmra.mxu0 %vm133_vm0, %v25_v27  ;;  %340 = vmatmul.msk.f32.gmra.mxu2 %vm133_vm0, %v31_v28 }
  0x25   :  { %65 = vperm.xlu1 %350, %v39_v29  }
  0x27   :  { %60 = vperm.xlu2 %351, %v38_v30  }
  0x2a   :  { %55 = vperm.xlu0 %349, %v37_v31  }
  0x2c   :  { %335 = vmatmul.msk.f32.gmra.mxu0 %vm133_vm0, %v26_v32  ;;  %341 = vmatmul.msk.f32.gmra.mxu2 %vm133_vm0, %v32_v33 }
  0x2d   :  { %267 = vperm.xlu1 %350, %v264_v34  }
  0x61   :  { %v111_v42 = vpop.permute.xlu2 %110 }
  0x69   :  { %v106_v51 = vpop.permute.xlu2 %105 }
  0x71   :  { %v91_v0 = vpop.permute.xlu2 %90 }
  0x74   :  { %v131_v38 = vpop.permute.xlu0 %130 }
  0x77   :  { %v121_v43 = vpop.permute.xlu1 %120 }
  0x79   :  { %v76_v11 = vpop.permute.xlu2 %75 }
  0x7c   :  { %v126_v46 = vpop.permute.xlu0 %125 }
  0x7f   :  { %v116_v50 = vpop.permute.xlu1 %115 }
  0x81   :  { %v505_v35 = vpop.f32.mrf.mxu0  ;;  %v61_v25 = vpop.permute.xlu2 %60 }
  0x84   :  { %v101_v54 = vpop.permute.xlu0 %100 }
  0x87   :  { %v217_v36 = vpop.f32.mrf.mxu2  ;;  %v96_v63 = vpop.permute.xlu1 %95 }
  0x88   :  { %v235_v37 = vpop.f32.mrf.mxu3 }
  0x89   :  { %v507_v39 = vpop.f32.mrf.mxu0  ;;  %v236_v58 = vadd.f32 %v235_v37, %v116_v50  ;;  %v290_v37 = vlaneseq }
  0x8a   :  { %v203_v30 = vadd.f32 %v507_v39, %v61_v25 }
  0x8b   :  { %v259_v62 = vmax.f32 %v236_v58, 0.0 }
  0x8c   :  { %v86_v1 = vpop.permute.xlu0 %85  ;;  %v248_v33 = vmax.f32 %v203_v30, 0.0 }
  0x8d   :  { %v218_v16 = vadd.f32 %v217_v36, %v86_v1  ;;  %v263_v36 = vld [vmem:[%s523_s3] sm:$0xff] }
  0x8f   :  { %v220_v40 = vpop.f32.mrf.mxu2  ;;  %v81_v10 = vpop.permute.xlu1 %80  ;;  %v253_v20 = vmax.f32 %v218_v16, 0.0 }
  0x90   :  { %v238_v41 = vpop.f32.mrf.mxu3  ;;  %v221_v12 = vadd.f32 %v220_v40, %v91_v0 }
  0x91   :  { %v205_v47 = vpop.f32.mrf.mxu0  ;;  %v239_v55 = vadd.f32 %v238_v41, %v121_v43 }
  0x92   :  { %v254_v18 = vmax.f32 %v221_v12, 0.0 }
  0x93   :  { %v260_v60 = vmax.f32 %v239_v55, 0.0 }
  0x94   :  { %v71_v14 = vpop.permute.xlu0 %70 }
  0x97   :  { %v223_v44 = vpop.f32.mrf.mxu2  ;;  %v66_v24 = vpop.permute.xlu1 %65 }
  0x98   :  { %v241_v45 = vpop.f32.mrf.mxu3  ;;  %v224_v8 = vadd.f32 %v223_v44, %v96_v63  ;;  %v206_v26 = vadd.f32 %v205_v47, %v66_v24 }
  0x99   :  { %v242_v52 = vadd.f32 %v241_v45, %v126_v46  ;;  %v208_v56 = vpop.f32.mrf.mxu0 }
  0x9a   :  { %v255_v17 = vmax.f32 %v224_v8, 0.0  ;;  %v209_v22 = vadd.f32 %v208_v56, %v71_v14  ;;  %v249_v31 = vmax.f32 %v206_v26, 0.0 }
  0x9b   :  { %v261_v59 = vmax.f32 %v242_v52, 0.0 }
  0x9c   :  { %v56_v28 = vpop.permute.xlu0 %55  ;;  %v250_v29 = vmax.f32 %v209_v22, 0.0 }
  0x9d   :  { %v200_v32 = vadd.f32 %v505_v35, %v56_v28 }
  0x9f   :  { %v226_v48 = vpop.f32.mrf.mxu2  ;;  %v247_v34 = vmax.f32 %v200_v32, 0.0  ;;  %v268_v40 = vpop.permute.xlu1 %267 }
  0xa0   :  { %v244_v49 = vpop.f32.mrf.mxu3  ;;  %v227_v6 = vadd.f32 %v226_v48, %v101_v54 }
  0xa1   :  { %v245_v53 = vadd.f32 %v244_v49, %v131_v38  ;;  %v211_v2 = vpop.f32.mrf.mxu0  ;;  %v291_v38 = vshrl.u32 %v290_v37, 7 }
  0xa2   :  { %v256_v13 = vmax.f32 %v227_v6, 0.0  ;;  %v212_v21 = vadd.f32 %v211_v2, %v76_v11 }
  0xa3   :  { %v262_v57 = vmax.f32 %v245_v53, 0.0  ;;  %vm292_vm1 = vcmp.lt.s32.totalorder %v291_v38, 4 }
  0xa4   :  { %v251_v27 = vmax.f32 %v212_v21, 0.0 }
  0xa5   :  { %270 = vmatpush.msra.mxu1 %v262_v57 }
  0xa7   :  { %271 = vmatpush.msra.mxu1 %v261_v59  ;;  %v229_v61 = vpop.f32.mrf.mxu2 }
  0xa8   :  { %v230_v4 = vadd.f32 %v229_v61, %v106_v51 }
  0xa9   :  { %272 = vmatpush.msra.mxu1 %v260_v60  ;;  %v214_v15 = vpop.f32.mrf.mxu0 }
  0xaa   :  { %v257_v9 = vmax.f32 %v230_v4, 0.0  ;;  %v215_v19 = vadd.f32 %v214_v15, %v81_v10 }
  0xab   :  { %273 = vmatpush.msra.mxu1 %v259_v62 }
  0xac   :  { %v252_v23 = vmax.f32 %v215_v19, 0.0 }
  0xaf   :  { %v232_v3 = vpop.f32.mrf.mxu2 }
  0xb0   :  { %v233_v5 = vadd.f32 %v232_v3, %v111_v42 }
  0xb2   :  { %v258_v7 = vmax.f32 %v233_v5, 0.0 }
  0xb4   :  { %274 = vmatpush.msra.mxu1 %v258_v7 }
  0xb6   :  { %275 = vmatpush.msra.mxu1 %v257_v9 }
  0xb8   :  { %276 = vmatpush.msra.mxu1 %v256_v13 }
  0xba   :  { %277 = vmatpush.msra.mxu1 %v255_v17 }
  0xbc   :  { %278 = vmatpush.msra.mxu1 %v254_v18 }
  0xbe   :  { %279 = vmatpush.msra.mxu1 %v253_v20 }
  0xc0   :  { %280 = vmatpush.msra.mxu1 %v252_v23 }
  0xc2   :  { %281 = vmatpush.msra.mxu1 %v251_v27 }
  0xc4   :  { %282 = vmatpush.msra.mxu1 %v250_v29 }
  0xc6   :  { %283 = vmatpush.msra.mxu1 %v249_v31 }
  0xc8   :  { %284 = vmatpush.msra.mxu1 %v248_v33 }
  0xca   :  { %285 = vmatpush.msra.mxu1 %v247_v34 }
  0xcb   :  { %286 = vmatmul.f32.vlgmr.msra.gmra.mxu1 %v263_v36 }
 0x148   :  { %v287_v41 = vpop.f32.mrf.mxu1 }
 0x149   :  { %v288_v39 = vadd.f32 %v287_v41, %v268_v40 }
 0x14b   :  { %v293_v42 = vsel %vm292_vm1, %v288_v39, -1e+30 }
 0x14c   :  { %v294_v35 = vrot.slane %v293_v42, 4 }
 0x14e   :  { %v295_v43 = vmax.f32 %v293_v42, %v294_v35 }
 0x150   :  { %v296_v44 = vrot.slane %v295_v43, 2 }
 0x152   :  { %v297_v45 = vmax.f32 %v295_v43, %v296_v44 }
 0x154   :  { %v298_v46 = vrot.slane %v297_v45, 1 }
 0x156   :  { %v299_v47 = vmax.f32 %v297_v45, %v298_v46 }
 0x158   :  { %v300_v48 = vsub.f32 %v293_v42, %v299_v47 }
 0x15a   :  { %v301_v49 = vmul.f32 1.442695, %v300_v48 }
 0x15c   :  { %352 = vpow2.f32 %v301_v49 }
 0x162   :  { %v353_v50 = vpop.eup %352 }
 0x163   :  { %v303_v51 = vrot.slane %v353_v50, 4 }
 0x165   :  { %v304_v52 = vadd.f32 %v353_v50, %v303_v51 }
 0x167   :  { %v305_v53 = vrot.slane %v304_v52, 2 }
 0x169   :  { %v306_v54 = vadd.f32 %v305_v53, %v304_v52 }
 0x16b   :  { %v307_v55 = vrot.slane %v306_v54, 1 }
 0x16d   :  { %v308_v56 = vadd.f32 %v307_v55, %v306_v54 }
 0x16f   :  { %354 = vrcp.f32 %v308_v56  ;;  %v320_v60 = vand.u32 2147483648, %v308_v56  ;;  %v318_v62 = vand.u32 2147483647, %v308_v56  ;;  %vm314_vm3 = vweird.f32 %v308_v56 }
 0x171   :  { %v321_v0 = vor.u32 1.1754944e-38, %v320_v60  ;;  %vm319_vm5 = vcmp.eq.f32.partialorder %v318_v62, 8.507059e+37 }
 0x175   :  { %v355_v57 = vpop.eup %354 }
 0x176   :  { %v310_v58 = vmul.f32 %v355_v57, %v308_v56  ;;  %vm315_vm2 = vweird.f32 %v355_v57 }
 0x177   :  { %vm316_vm4 = vmor %vm314_vm3, %vm315_vm2 }
 0x178   :  { %v311_v59 = vsub.f32 1.0, %v310_v58 }
 0x17a   :  { %v312_v61 = vmul.f32 %v355_v57, %v311_v59 }
 0x17c   :  { %v313_v63 = vadd.f32 %v355_v57, %v312_v61 }
 0x17e   :  { %v317_v1 = vsel %vm316_vm4, %v355_v57, %v313_v63 }
 0x17f   :  { %v322_v2 = vsel %vm319_vm5, %v321_v0, %v317_v1 }
 0x180   :  { %v323_v3 = vmul.f32 %v353_v50, %v322_v2 }
 0x182   :  { %v324_v4 = vsel %vm292_vm1, %v323_v3, %v288_v39 }
 0x183   :  { %325 = vst [vmem:[%s524_s5] sm:$0xff] %v324_v4 }

</bundles_post_ra>
